<compile_context>
chip_gen: v7x
topology: tpu7x:2x2x1
jax: 0.10.0
libtpu: 0.0.40
codegen_flags: <defaults>
</compile_context>

<pallas_src>
import functools

import jax
import jax.numpy as jnp
from jax import lax
from jax.experimental import pallas as pl
from jax.experimental.pallas import tpu as pltpu


# ----------------------------- Pallas kernel -------------------------------

def _wide_and_deep_kernel(x_ref, lr_ref,
                          w1_ref, b1_ref,
                          w2_ref, b2_ref,
                          w3_ref, b3_ref,
                          w4_ref,
                          out_ref):
    """Batch-on-lanes pipeline (after the in-kernel fc1 transpose).

    x_ref  : (TB, IN) bf16   flattened (embedding * val), natural layout
    lr_ref : (1,  TB) f32    sum_f(feature_bias*val) + global_bias + fc4.bias
    w*_ref : (out, in) bf16  PyTorch Linear weight layout (fc1..fc3)
    b*_ref : (out, 1)  f32
    w4_ref : (H, 1)    f32   fc4 weight as a column (used on the VPU)
    out_ref: (1, TB)   f32   final prediction row (lane-dense)
    """
    x = x_ref[...]                                                     # (TB, IN) bf16

    # fc1: contract IN of both operands -> (H, TB).  The IN<->TB transpose of
    # the streamed activation tile is done in-kernel (XLU slot, hidden under
    # the MXU), avoiding a materialized HBM transpose in the glue.
    h = lax.dot_general(w1_ref[...], x, (((1,), (1,)), ((), ())),
                        preferred_element_type=jnp.float32) + b1_ref[...]
    h = jnp.maximum(h, 0.0).astype(jnp.bfloat16)                       # (H, TB)

    h = jnp.dot(w2_ref[...], h, preferred_element_type=jnp.float32) + b2_ref[...]
    h = jnp.maximum(h, 0.0).astype(jnp.bfloat16)                       # (H, TB)

    h = jnp.dot(w3_ref[...], h, preferred_element_type=jnp.float32) + b3_ref[...]
    h = jnp.maximum(h, 0.0)                                            # (H, TB) f32

    # fc4 (H -> 1): VPU multiply + sublane reduce, keeps the MXU free.
    dnn = jnp.sum(h * w4_ref[...], axis=0, keepdims=True)              # (1, TB) f32

    out_ref[...] = dnn + lr_ref[...]


def wide_and_deep_pallas(x, lr_row, params, block_batch=512):
    """x: (B, IN) bf16 natural layout; lr_row: (1, B) f32 (wide path + biases)."""
    B, IN = x.shape
    TB = block_batch
    assert TB % 128 == 0, "batch tile must be a multiple of the 128-lane width"
    # >=256 recommended (fills the 2x256^2 MXU N axis on v6e/v7x); 512-1024
    # preferred to amortize per-grid-step pipeline overhead.

    # Pad batch up to a multiple of the tile (padded rows sliced off below).
    n_tiles = pl.cdiv(B, TB)
    Bp = n_tiles * TB
    if Bp != B:
        x = jnp.pad(x, ((0, Bp - B), (0, 0)))
        lr_row = jnp.pad(lr_row, ((0, 0), (0, Bp - B)))

    w1 = params["w1"].astype(jnp.bfloat16)
    w2 = params["w2"].astype(jnp.bfloat16)
    w3 = params["w3"].astype(jnp.bfloat16)
    b1, b2, b3 = params["b1"], params["b2"], params["b3"]
    w4 = params["w4"]                      # (H, 1) f32, stays f32 for the VPU path

    def resident(arr):
        # Same block every grid step -> weight stays in VMEM, no re-DMA.
        return pl.BlockSpec(arr.shape, lambda i: (0, 0))

    # v5e's scoped-VMEM default is 16 MiB; TB<=1024 fits comfortably, but a
    # 2048-wide tile needs an explicit limit bump (v6e/v7x tolerate it too).
    cp_kwargs = dict(dimension_semantics=("parallel",))
    if TB > 1024:
        cp_kwargs["vmem_limit_bytes"] = 64 * 1024 * 1024

    out = pl.pallas_call(
        _wide_and_deep_kernel,
        out_shape=jax.ShapeDtypeStruct((1, Bp), jnp.float32),
        grid=(n_tiles,),
        in_specs=[
            pl.BlockSpec((TB, IN), lambda i: (i, 0)),   # streamed activations
            pl.BlockSpec((1, TB), lambda i: (0, i)),    # streamed wide-path row
            resident(w1), resident(b1),
            resident(w2), resident(b2),
            resident(w3), resident(b3),
            resident(w4),
        ],
        out_specs=pl.BlockSpec((1, TB), lambda i: (0, i)),
        compiler_params=pltpu.CompilerParams(**cp_kwargs),
    )(x, lr_row, w1, b1, w2, b2, w3, b3, w4)

    return out[0, :B]   # matches PyTorch .squeeze() -> (B,)


# ------------------------- glue: embedding + params ------------------------

def init_params(key, num_features, embedding_dim, num_fields, hidden_size):
    ks = jax.random.split(key, 10)
    input_dim = embedding_dim * num_fields

    def xavier_normal(k, shape):
        fan_in, fan_out = shape[0], shape[1]
        std = (2.0 / (fan_in + fan_out)) ** 0.5
        return std * jax.random.normal(k, shape, dtype=jnp.float32)

    def linear(kw, kb, fan_in, fan_out):
        # PyTorch nn.Linear default: U(-1/sqrt(fan_in), 1/sqrt(fan_in));
        # weight kept in the PyTorch (out, in) layout.
        bound = 1.0 / (fan_in ** 0.5)
        w = jax.random.uniform(kw, (fan_out, fan_in), jnp.float32, -bound, bound)
        b = jax.random.uniform(kb, (fan_out, 1), jnp.float32, -bound, bound)
        return w, b

    emb_table = xavier_normal(ks[0], (num_features, embedding_dim))
    bias_table = xavier_normal(ks[1], (num_features, 1))

    w1, b1 = linear(ks[2], ks[3], input_dim, hidden_size)
    w2, b2 = linear(ks[4], ks[5], hidden_size, hidden_size)
    w3, b3 = linear(ks[6], ks[7], hidden_size, hidden_size)
    w4, b4 = linear(ks[8], ks[9], hidden_size, 1)      # (1, H), (1, 1)

    return {
        "emb_table": emb_table,
        "bias_table": bias_table,
        "w1": w1, "b1": b1,
        "w2": w2, "b2": b2,
        "w3": w3, "b3": b3,
        "w4": w4.T,                  # (H, 1) column for the VPU final layer
        "b4": b4[:, 0],              # (1,) folded into the wide-path row
        "gbias": jnp.zeros((1,), jnp.float32),
    }


def wide_and_deep_forward(feature_ids, feature_vals, params, block_batch=512):
    # Deep path input: gather + val-scale + bf16 cast fuse into a single XLA
    # op producing the natural (B, IN) layout — no materialized HBM transpose.
    emb = jnp.take(params["emb_table"], feature_ids, axis=0)            # (B, F, D)
    emb = emb * feature_vals[:, :, None]                                # (B, F, D)
    B = emb.shape[0]
    x = emb.reshape(B, -1).astype(jnp.bfloat16)                         # (B, F*D)

    # Wide/LR path pre-reduced in glue; fc4 bias and global bias folded in.
    fbias = jnp.take(params["bias_table"], feature_ids, axis=0)[..., 0]  # (B, F)
    lr = jnp.sum(fbias * feature_vals, axis=1) + params["gbias"] + params["b4"]
    lr_row = lr[None, :].astype(jnp.float32)                            # (1, B)

    return wide_and_deep_pallas(x, lr_row, params, block_batch)


# Pure-JAX reference (same bf16/f32 casting points as the kernel).
def reference_forward(feature_ids, feature_vals, params):
    emb = jnp.take(params["emb_table"], feature_ids, axis=0) * feature_vals[:, :, None]
    x = emb.reshape(emb.shape[0], -1).astype(jnp.bfloat16)              # (B, IN)
    w1 = params["w1"].astype(jnp.bfloat16)
    w2 = params["w2"].astype(jnp.bfloat16)
    w3 = params["w3"].astype(jnp.bfloat16)
    h = jnp.maximum(jnp.dot(x, w1.T, preferred_element_type=jnp.float32)
                    + params["b1"][:, 0], 0.0).astype(jnp.bfloat16)
    h = jnp.maximum(jnp.dot(h, w2.T, preferred_element_type=jnp.float32)
                    + params["b2"][:, 0], 0.0).astype(jnp.bfloat16)
    h = jnp.maximum(jnp.dot(h, w3.T, preferred_element_type=jnp.float32)
                    + params["b3"][:, 0], 0.0)
    dnn = h @ params["w4"][:, 0] + params["b4"]
    fbias = jnp.take(params["bias_table"], feature_ids, axis=0)[..., 0]
    lr = jnp.sum(fbias * feature_vals, axis=1) + params["gbias"]
    return dnn + lr


if __name__ == "__main__":
    # Small shapes consistent with the module's forward (toy fields/hidden).
    # batch=384 with block_batch=256 exercises a multi-tile grid including a
    # padded final tile (2 tiles, last one half-full).
    num_features = 100
    embedding_dim = 8
    num_fields = 8
    hidden_size = 32
    batch = 384

    key = jax.random.PRNGKey(0)
    k_params, k_ids, k_vals = jax.random.split(key, 3)

    params = init_params(k_params, num_features, embedding_dim, num_fields, hidden_size)

    feature_ids = jax.random.randint(k_ids, (batch, num_fields), 0, num_features,
                                     dtype=jnp.int32)
    feature_vals = jax.random.uniform(k_vals, (batch, num_fields), dtype=jnp.float32)

    fwd = jax.jit(functools.partial(wide_and_deep_forward, block_batch=256))
    out = fwd(feature_ids, feature_vals, params)
    out = jax.block_until_ready(out)

    ref = reference_forward(feature_ids, feature_vals, params)
    assert out.shape == (batch,)
    max_err = float(jnp.max(jnp.abs(out - ref)))
    assert jnp.allclose(out, ref, atol=2e-3, rtol=2e-3), f"max abs err {max_err}"

    print("KERNEL_OK")
</pallas_src>

<mosaic_0001>
module attributes {stable_mosaic.version = 11 : i64} {
  func.func @_wide_and_deep_kernel(%arg0: i32, %arg1: memref<256x64xbf16, #tpu.memory_space<vmem>>, %arg2: memref<1x256xf32, #tpu.memory_space<vmem>>, %arg3: memref<32x64xbf16, #tpu.memory_space<vmem>>, %arg4: memref<32x1xf32, #tpu.memory_space<vmem>>, %arg5: memref<32x32xbf16, #tpu.memory_space<vmem>>, %arg6: memref<32x1xf32, #tpu.memory_space<vmem>>, %arg7: memref<32x32xbf16, #tpu.memory_space<vmem>>, %arg8: memref<32x1xf32, #tpu.memory_space<vmem>>, %arg9: memref<32x1xf32, #tpu.memory_space<vmem>>, %arg10: memref<1x256xf32, #tpu.memory_space<vmem>>) attributes {dimension_semantics = [#tpu.dimension_semantics<parallel>], iteration_bounds = array<i64: 2>, scalar_prefetch = 0 : i64, scratch_operands = 0 : i64, tpu.core_type = #tpu.core_type<tc>, window_params = [{transform_indices = @transform_0, window_bounds = array<i64: 256, 64>}, {transform_indices = @transform_1, window_bounds = array<i64: 1, 256>}, {pipeline_mode = #tpu.pipeline_mode<synchronous>, transform_indices = @transform_2, window_bounds = array<i64: 32, 64>}, {pipeline_mode = #tpu.pipeline_mode<synchronous>, transform_indices = @transform_3, window_bounds = array<i64: 32, 1>}, {pipeline_mode = #tpu.pipeline_mode<synchronous>, transform_indices = @transform_4, window_bounds = array<i64: 32, 32>}, {pipeline_mode = #tpu.pipeline_mode<synchronous>, transform_indices = @transform_5, window_bounds = array<i64: 32, 1>}, {pipeline_mode = #tpu.pipeline_mode<synchronous>, transform_indices = @transform_6, window_bounds = array<i64: 32, 32>}, {pipeline_mode = #tpu.pipeline_mode<synchronous>, transform_indices = @transform_7, window_bounds = array<i64: 32, 1>}, {pipeline_mode = #tpu.pipeline_mode<synchronous>, transform_indices = @transform_8, window_bounds = array<i64: 32, 1>}, {transform_indices = @transform_9, window_bounds = array<i64: 1, 256>}]} {
    %c0 = arith.constant 0 : index
    %c0_0 = arith.constant 0 : index
    %0 = vector.load %arg1[%c0, %c0_0] : memref<256x64xbf16, #tpu.memory_space<vmem>>, vector<256x64xbf16>
    %c0_1 = arith.constant 0 : index
    %c0_2 = arith.constant 0 : index
    %1 = vector.load %arg3[%c0_1, %c0_2] : memref<32x64xbf16, #tpu.memory_space<vmem>>, vector<32x64xbf16>
    %cst = arith.constant dense<0.000000e+00> : vector<32x256xf32>
    %2 = tpu.matmul %1, %0, %cst {dimension_numbers = #tpu.dot_dimension_numbers<[1], [1], [0], [0], [0, 0, 1, 0], [], []>} : vector<32x64xbf16>, vector<256x64xbf16>, vector<32x256xf32> -> vector<32x256xf32>
    %c0_3 = arith.constant 0 : index
    %c0_4 = arith.constant 0 : index
    %3 = vector.load %arg4[%c0_3, %c0_4] : memref<32x1xf32, #tpu.memory_space<vmem>>, vector<32x1xf32>
    %4 = vector.broadcast %3 : vector<32x1xf32> to vector<32x256xf32>
    %5 = arith.addf %2, %4 : vector<32x256xf32>
    %cst_5 = arith.constant 0.000000e+00 : f32
    %6 = vector.broadcast %cst_5 : f32 to vector<32x256xf32>
    %7 = arith.maximumf %5, %6 : vector<32x256xf32>
    %8 = arith.truncf %7 : vector<32x256xf32> to vector<32x256xbf16>
    %c0_6 = arith.constant 0 : index
    %c0_7 = arith.constant 0 : index
    %9 = vector.load %arg5[%c0_6, %c0_7] : memref<32x32xbf16, #tpu.memory_space<vmem>>, vector<32x32xbf16>
    %cst_8 = arith.constant dense<0.000000e+00> : vector<32x256xf32>
    %10 = tpu.matmul %9, %8, %cst_8 {dimension_numbers = #tpu.dot_dimension_numbers<[1], [0], [0], [1], [0, 0, 1, 1], [], []>} : vector<32x32xbf16>, vector<32x256xbf16>, vector<32x256xf32> -> vector<32x256xf32>
    %c0_9 = arith.constant 0 : index
    %c0_10 = arith.constant 0 : index
    %11 = vector.load %arg6[%c0_9, %c0_10] : memref<32x1xf32, #tpu.memory_space<vmem>>, vector<32x1xf32>
    %12 = vector.broadcast %11 : vector<32x1xf32> to vector<32x256xf32>
    %13 = arith.addf %10, %12 : vector<32x256xf32>
    %cst_11 = arith.constant 0.000000e+00 : f32
    %14 = vector.broadcast %cst_11 : f32 to vector<32x256xf32>
    %15 = arith.maximumf %13, %14 : vector<32x256xf32>
    %16 = arith.truncf %15 : vector<32x256xf32> to vector<32x256xbf16>
    %c0_12 = arith.constant 0 : index
    %c0_13 = arith.constant 0 : index
    %17 = vector.load %arg7[%c0_12, %c0_13] : memref<32x32xbf16, #tpu.memory_space<vmem>>, vector<32x32xbf16>
    %cst_14 = arith.constant dense<0.000000e+00> : vector<32x256xf32>
    %18 = tpu.matmul %17, %16, %cst_14 {dimension_numbers = #tpu.dot_dimension_numbers<[1], [0], [0], [1], [0, 0, 1, 1], [], []>} : vector<32x32xbf16>, vector<32x256xbf16>, vector<32x256xf32> -> vector<32x256xf32>
    %c0_15 = arith.constant 0 : index
    %c0_16 = arith.constant 0 : index
    %19 = vector.load %arg8[%c0_15, %c0_16] : memref<32x1xf32, #tpu.memory_space<vmem>>, vector<32x1xf32>
    %20 = vector.broadcast %19 : vector<32x1xf32> to vector<32x256xf32>
    %21 = arith.addf %18, %20 : vector<32x256xf32>
    %cst_17 = arith.constant 0.000000e+00 : f32
    %22 = vector.broadcast %cst_17 : f32 to vector<32x256xf32>
    %23 = arith.maximumf %21, %22 : vector<32x256xf32>
    %c0_18 = arith.constant 0 : index
    %c0_19 = arith.constant 0 : index
    %24 = vector.load %arg9[%c0_18, %c0_19] : memref<32x1xf32, #tpu.memory_space<vmem>>, vector<32x1xf32>
    %25 = vector.broadcast %24 : vector<32x1xf32> to vector<32x256xf32>
    %26 = arith.mulf %23, %25 : vector<32x256xf32>
    %cst_20 = arith.constant dense<0.000000e+00> : vector<256xf32>
    %27 = vector.multi_reduction <add>, %26, %cst_20 [0] : vector<32x256xf32> to vector<256xf32>
    %28 = vector.shape_cast %27 : vector<256xf32> to vector<1x256xf32>
    %c0_21 = arith.constant 0 : index
    %c0_22 = arith.constant 0 : index
    %29 = vector.load %arg2[%c0_21, %c0_22] : memref<1x256xf32, #tpu.memory_space<vmem>>, vector<1x256xf32>
    %30 = arith.addf %28, %29 : vector<1x256xf32>
    %c0_23 = arith.constant 0 : index
    %c0_24 = arith.constant 0 : index
    %31 = vector.load %arg10[%c0_23, %c0_24] : memref<1x256xf32, #tpu.memory_space<vmem>>, vector<1x256xf32>
    tpu.vector_store %arg10[%c0_23, %c0_24], %30 {strides = array<i32>} : memref<1x256xf32, #tpu.memory_space<vmem>>, vector<1x256xf32>,
    return
  }
  func.func @transform_0(%arg0: i32) -> (i32, i32) {
    %c0_i32 = arith.constant 0 : i32
    %c0_i32_0 = arith.constant 0 : i32
    return %arg0, %c0_i32 : i32, i32
  }
  func.func @transform_1(%arg0: i32) -> (i32, i32) {
    %c0_i32 = arith.constant 0 : i32
    %c0_i32_0 = arith.constant 0 : i32
    return %c0_i32, %arg0 : i32, i32
  }
  func.func @transform_2(%arg0: i32) -> (i32, i32) {
    %c0_i32 = arith.constant 0 : i32
    %c0_i32_0 = arith.constant 0 : i32
    %c0_i32_1 = arith.constant 0 : i32
    return %c0_i32, %c0_i32_0 : i32, i32
  }
  func.func @transform_3(%arg0: i32) -> (i32, i32) {
    %c0_i32 = arith.constant 0 : i32
    %c0_i32_0 = arith.constant 0 : i32
    %c0_i32_1 = arith.constant 0 : i32
    return %c0_i32, %c0_i32_0 : i32, i32
  }
  func.func @transform_4(%arg0: i32) -> (i32, i32) {
    %c0_i32 = arith.constant 0 : i32
    %c0_i32_0 = arith.constant 0 : i32
    %c0_i32_1 = arith.constant 0 : i32
    return %c0_i32, %c0_i32_0 : i32, i32
  }
  func.func @transform_5(%arg0: i32) -> (i32, i32) {
    %c0_i32 = arith.constant 0 : i32
    %c0_i32_0 = arith.constant 0 : i32
    %c0_i32_1 = arith.constant 0 : i32
    return %c0_i32, %c0_i32_0 : i32, i32
  }
  func.func @transform_6(%arg0: i32) -> (i32, i32) {
    %c0_i32 = arith.constant 0 : i32
    %c0_i32_0 = arith.constant 0 : i32
    %c0_i32_1 = arith.constant 0 : i32
    return %c0_i32, %c0_i32_0 : i32, i32
  }
  func.func @transform_7(%arg0: i32) -> (i32, i32) {
    %c0_i32 = arith.constant 0 : i32
    %c0_i32_0 = arith.constant 0 : i32
    %c0_i32_1 = arith.constant 0 : i32
    return %c0_i32, %c0_i32_0 : i32, i32
  }
  func.func @transform_8(%arg0: i32) -> (i32, i32) {
    %c0_i32 = arith.constant 0 : i32
    %c0_i32_0 = arith.constant 0 : i32
    %c0_i32_1 = arith.constant 0 : i32
    return %c0_i32, %c0_i32_0 : i32, i32
  }
  func.func @transform_9(%arg0: i32) -> (i32, i32) {
    %c0_i32 = arith.constant 0 : i32
    %c0_i32_0 = arith.constant 0 : i32
    return %c0_i32, %arg0 : i32, i32
  }
}

</mosaic_0001>

<bundles_post_ra>
// kernel: wide_and_deep_forward.1
= control target key start
LH: loop header
LB: loop body
LE: loop exit
PB: predicated region body
PF: predicated region fallthrough
CT: control target
= control target key end

     0   :  { %s1146_s30 = smov 0   ;;  %s1292_s0 = inlined_call_operand.vmem [shape: bf16[512,64], index: 0, kind: input, shape index: {}]   ;;  %s1293_s1 = inlined_call_operand.vmem [shape: f32[1,512], index: 1, kind: input, shape index: {}]   ;;  %s1294_s2 = inlined_call_operand.vmem [shape: bf16[32,64], index: 2, kind: input, shape index: {}]   ;;  %s1295_s3 = inlined_call_operand.vmem [shape: f32[32,1], index: 3, kind: input, shape index: {}]   ;;  %s1296_s4 = inlined_call_operand.vmem [shape: bf16[32,32], index: 4, kind: input, shape index: {}]   ;;  %s1297_s5 = inlined_call_operand.vmem [shape: f32[32,1], index: 5, kind: input, shape index: {}]   ;;  %s1298_s6 = inlined_call_operand.vmem [shape: bf16[32,32], index: 6, kind: input, shape index: {}]   ;;  %s1299_s7 = inlined_call_operand.vmem [shape: f32[32,1], index: 7, kind: input, shape index: {}]   ;;  %s1300_s8 = inlined_call_operand.vmem [shape: f32[32,1], index: 8, kind: input, shape index: {}]   ;;  %s1301_s9 = inlined_call_operand.vmem [shape: f32[1,512], index: 9, kind: output, shape index: {}]  }
   0x1 LB: > { %s985_s10 = sadd.s32 4294967295, %s1092_s30   ;;  %p989_p0 = scmp.ge.s32.totalorder %s1092_s30, 1  ;;  %s1092_s30 = sphi %s1146_s30, %s19_s30  }
   0x2   : > { %p298_p1 = scmp.lt.s32.totalorder %s1092_s30, 3 }
   0x4   : > { %p299_p2 = pnand %p989_p0, %p298_p1 }
   0x5   : > { %s990_s11 = sshll.u32 (!%p299_p2), %s985_s10, 5  ;;  %v1159_v0 = vld [vmem:[%s1294_s2] sm:$0xff] (!%p299_p2)   ;;  %vm504_vm0 = vcmask (!%p299_p2), 523264   ;;  %v392_v2 = vld [vmem:[%s1295_s3 + $0x10] sm:$0xff] (!%p299_p2)  ;;  %v1094_v3 = vmov (!%p299_p2), 0   ;;  %v391_v4 = vld [vmem:[%s1295_s3 + $0x8] sm:$0xff] (!%p299_p2) }
   0x6   : > { %302 = sbr.rel (%p299_p2) target bundleno = 800 (0x320), region = 56  ;;  %p338_p3 = scmp.lt.s32.totalorder (!%p299_p2), %s990_s11, 63  ;;  %v390_v1 = vld [vmem:[%s1295_s3] sm:$0xff] (!%p299_p2)  ;;  %1040 = vmatprep.mubr.msk.bf16.mxu0 (!%p299_p2), %vm504_vm0, %v1159_v0  ;;  %1062 = vset.pattern.permute.xlu0 (!%p299_p2), %v1094_v3  ;;  %v393_v5 = vld [vmem:[%s1295_s3 + $0x18] sm:$0xff] (!%p299_p2)  ;;  %v629_v11 = vld [vmem:[%s1297_s5 + $0x8] sm:$0xff] (!%p299_p2)  ;;  %vm662_vm1 = vcmask (!%p299_p2), 261120  }
   0x7   : > { %396 = vperm.xlu0 (!%p299_p2), %1062, %v390_v1   ;;  %1063 = vset.pattern.permute.xlu1 (!%p299_p2), %v1094_v3  ;;  %v628_v7 = vld [vmem:[%s1297_s5] sm:$0xff] (!%p299_p2)  ;;  %v630_v13 = vld [vmem:[%s1297_s5 + $0x10] sm:$0xff] (!%p299_p2)  ;;  %v631_v14 = vld [vmem:[%s1297_s5 + $0x18] sm:$0xff] (!%p299_p2)  ;;  %s992_s22 = sshll.u32 (!%p299_p2), %s985_s10, 1 }
   0x8   : > { %406 = vperm.xlu1 (!%p299_p2), %1063, %v392_v2   ;;  %701 = vmatprep.mubr.bf16.mxu1 (!%p299_p2), %v1094_v3  ;;  %v738_v17 = vld [vmem:[%s1299_s7] sm:$0xff] (!%p299_p2)  ;;  %v739_v18 = vld [vmem:[%s1299_s7 + $0x8] sm:$0xff] (!%p299_p2)  ;;  %v740_v20 = vld [vmem:[%s1299_s7 + $0x10] sm:$0xff] (!%p299_p2)  ;;  %p344_p4 = scmp.lt.s32.totalorder (!%p299_p2), %s992_s22, 3 }
   0x9   : > { %v741_v21 = vld [vmem:[%s1299_s7 + $0x18] sm:$0xff] (!%p299_p2)  ;;  %v839_v22 = vld [vmem:[%s1300_s8] sm:$0xff] (!%p299_p2)  ;;  %v840_v25 = vld [vmem:[%s1300_s8 + $0x8] sm:$0xff] (!%p299_p2) }
   0xa   : > { %v841_v27 = vld [vmem:[%s1300_s8 + $0x10] sm:$0xff] (!%p299_p2)  ;;  %v842_v28 = vld [vmem:[%s1300_s8 + $0x18] sm:$0xff] (!%p299_p2)  ;;  %v1081_v42 = vld [vmem:[%s1294_s2 + $0x8] sm:$0xff] (!%p299_p2)  }
   0xb   : > { %401 = vperm.xlu0 (!%p299_p2), %1062, %v391_v4  }
   0xc   : > { %411 = vperm.xlu1 (!%p299_p2), %1063, %v393_v5  }
   0xd   : > { %s1303_s11 = smov (!%p338_p3, %s990_s11), 63  ;;  %s1305_s22 = smov (!%p344_p4, %s992_s22), 3 }
   0xe   : > { %s991_s18 = sshll.u32 %s1303_s11, 2  ;;  %s346_s25 = scalar_lea.vmem %s1293_s1, %s1305_s22 }
   0xf   : > { %s1178_s23 = scalar_lea.vmem %s1292_s0, %s991_s18  ;;  %634 = vperm.xlu0 %1062, %v628_v7   ;;  %s351_s28 = scalar_lea.vmem %s1301_s9, %s1305_s22 }
  0x10   : > { %v1064_v6 = vld [vmem:[%s1178_s23 + $0x40] sm:$0xff]   ;;  %v1066_v9 = vld [vmem:[%s1178_s23 + $0x48] sm:$0xff]   ;;  %639 = vperm.xlu1 %1063, %v629_v11   ;;  %v1068_v16 = vld [vmem:[%s1178_s23 + $0x50] sm:$0xff]  }
  0x11   : > { %v1065_v8 = vld [vmem:[%s1178_s23] sm:$0xff]   ;;  %1044 = vmatprep.subr.msk.bf16.mxu0 %vm504_vm0, %v1064_v6  ;;  %v1067_v12 = vld [vmem:[%s1178_s23 + $0x8] sm:$0xff]   ;;  %v1069_v19 = vld [vmem:[%s1178_s23 + $0x10] sm:$0xff]  }
  0x12   : > { %v512_v10 = vsel %vm504_vm0, %v1065_v8, 0  ;;  %v515_v15 = vsel %vm504_vm0, %v1067_v12, 0  ;;  %v518_v23 = vsel %vm504_vm0, %v1069_v19, 0  ;;  %v1070_v24 = vld [vmem:[%s1178_s23 + $0x58] sm:$0xff]   ;;  %v1072_v30 = vld [vmem:[%s1178_s23 + $0x60] sm:$0xff]   ;;  %v1074_v33 = vld [vmem:[%s1178_s23 + $0x68] sm:$0xff]  }
  0x13   : > { %1025 = vmatpush3.bf16.xpose.msra.mxu0 %v512_v10  ;;  %644 = vperm.xlu0 %1062, %v630_v13   ;;  %v1071_v26 = vld [vmem:[%s1178_s23 + $0x18] sm:$0xff]   ;;  %v1073_v31 = vld [vmem:[%s1178_s23 + $0x20] sm:$0xff]   ;;  %v1075_v34 = vld [vmem:[%s1178_s23 + $0x28] sm:$0xff]  }
  0x14   : > { %1045 = vmatprep.subr.msk.bf16.mxu0 %vm504_vm0, %v1066_v9  ;;  %649 = vperm.xlu1 %1063, %v631_v14   ;;  %v521_v29 = vsel %vm504_vm0, %v1071_v26, 0  ;;  %v524_v32 = vsel %vm504_vm0, %v1073_v31, 0  ;;  %v527_v35 = vsel %vm504_vm0, %v1075_v34, 0  ;;  %v1076_v36 = vld [vmem:[%s1178_s23 + $0x70] sm:$0xff]   ;;  %v1078_v39 = vld [vmem:[%s1178_s23 + $0x78] sm:$0xff]   ;;  %v1082_v12 = vld [vmem:[%s1296_s4] sm:$0xff]  }
  0x15   : > { %v1077_v37 = vld [vmem:[%s1178_s23 + $0x30] sm:$0xff]   ;;  %v1079_v40 = vld [vmem:[%s1178_s23 + $0x38] sm:$0xff]   ;;  %v1083_v13 = vld [vmem:[%s1296_s4 + $0x8] sm:$0xff]  }
  0x16   : > { %v530_v38 = vsel %vm504_vm0, %v1077_v37, 0  ;;  %v533_v41 = vsel %vm504_vm0, %v1079_v40, 0 }
  0x17   : > { %744 = vperm.xlu0 %1062, %v738_v17  }
  0x18   : > { %749 = vperm.xlu1 %1063, %v739_v18  }
  0x1b   : > { %1027 = vmatpush3.bf16.xpose.msra.mxu0 %v515_v15  ;;  %754 = vperm.xlu0 %1062, %v740_v20  }
  0x1c   : > { %1046 = vmatprep.subr.msk.bf16.mxu0 %vm504_vm0, %v1068_v16  ;;  %759 = vperm.xlu1 %1063, %v741_v21  }
  0x1f   : > { %845 = vperm.xlu0 %1062, %v839_v22  }
  0x20   : > { %850 = vperm.xlu1 %1063, %v840_v25  }
  0x23   : > { %1029 = vmatpush3.bf16.xpose.msra.mxu0 %v518_v23  ;;  %855 = vperm.xlu0 %1062, %v841_v27  }
  0x24   : > { %1047 = vmatprep.subr.msk.bf16.mxu0 %vm504_vm0, %v1070_v24  ;;  %860 = vperm.xlu1 %1063, %v842_v28  }
  0x2b   : > { %1031 = vmatpush3.bf16.xpose.msra.mxu0 %v521_v29 }
  0x2c   : > { %1048 = vmatprep.subr.msk.bf16.mxu0 %vm504_vm0, %v1072_v30 }
  0x33   : > { %1033 = vmatpush3.bf16.xpose.msra.mxu0 %v524_v32 }
  0x34   : > { %1049 = vmatprep.subr.msk.bf16.mxu0 %vm504_vm0, %v1074_v33 }
  0x3b   : > { %1035 = vmatpush3.bf16.xpose.msra.mxu0 %v527_v35 }
  0x3c   : > { %1050 = vmatprep.subr.msk.bf16.mxu0 %vm504_vm0, %v1076_v36 }
  0x43   : > { %1037 = vmatpush3.bf16.xpose.msra.mxu0 %v530_v38 }
  0x44   : > { %1051 = vmatprep.subr.msk.bf16.mxu0 %vm504_vm0, %v1078_v39 }
  0x4b   : > { %1039 = vmatpush3.bf16.xpose.msra.mxu0 %v533_v41 }
  0x52   : > { %1041 = vmatmul.mubr.msk.bf16.vlgmr.msra.gmra.mrb[0].mxu0 %vm504_vm0, %v1159_v0 }
  0x53   : > { %1042 = vmatprep.mubr.msk.bf16.mxu0 %vm504_vm0, %v1081_v42 }
  0x5a   : > { %1043 = vmatmul.mubr.msk.bf16.gmra.mrb[4].mxu0 %vm504_vm0, %v1081_v42 }
  0x86   : > { %v397_v43 = vpop.permute.xlu0 %396 }
  0x87   : > { %v407_v52 = vpop.permute.xlu1 %406 }
  0x8a   : > { %v402_v47 = vpop.permute.xlu0 %401 }
  0x8b   : > { %v412_v63 = vpop.permute.xlu1 %411 }
  0x8e   : > { %v635_v14 = vpop.permute.xlu0 %634 }
  0x8f   : > { %v640_v18 = vpop.permute.xlu1 %639 }
  0x92   : > { %v645_v29 = vpop.permute.xlu0 %644 }
  0x93   : > { %v650_v34 = vpop.permute.xlu1 %649 }
 0x125   : > { %v593_v44 = vpop.f32.mrb[0].mxu0 }
 0x126   : > { %v594_v45 = vadd.f32 %v593_v44, %v397_v43  ;;  %v595_v46 = vpop.f32.mrb[1].mxu0 }
 0x127   : > { %v596_v48 = vadd.f32 %v595_v46, %v397_v43  ;;  %v597_v49 = vpop.f32.mrb[2].mxu0  ;;  %v1084_v46 = vld [vmem:[%s1298_s6] sm:$0xff]  }
 0x128   : > { %v598_v50 = vadd.f32 %v597_v49, %v402_v47  ;;  %v599_v51 = vpop.f32.mrb[3].mxu0  ;;  %v612_v54 = vmax.f32 %v594_v45, 0.0  ;;  %v750_v49 = vpop.permute.xlu1 %749 }
 0x129   : > { %v600_v53 = vadd.f32 %v599_v51, %v402_v47  ;;  %v613_v56 = vmax.f32 %v596_v48, 0.0  ;;  %v1085_v47 = vld [vmem:[%s1298_s6 + $0x8] sm:$0xff]   ;;  %v745_v48 = vpop.permute.xlu0 %744 }
 0x12a   : > { %v614_v55 = vmax.f32 %v598_v50, 0.0 }
 0x12b   : > { %v615_v57 = vmax.f32 %v600_v53, 0.0 }
 0x12c   : > { %v620_v58 = vpack.c.bf16 %v614_v55, %v612_v54  ;;  %v760_v51 = vpop.permute.xlu1 %759 }
 0x12d   : > { %v603_v59 = vpop.f32.mrb[4].mxu0  ;;  %v621_v60 = vpack.c.bf16 %v615_v57, %v613_v56  ;;  %v755_v50 = vpop.permute.xlu0 %754 }
 0x12e   : > { %v604_v61 = vadd.f32 %v603_v59, %v407_v52  ;;  %v605_v62 = vpop.f32.mrb[5].mxu0 }
 0x12f   : > { %v606_v0 = vadd.f32 %v605_v62, %v407_v52  ;;  %v607_v1 = vpop.f32.mrb[6].mxu0  ;;  %669 = vmatprep.subr.bf16.mxu1 %v621_v60 }
 0x130   : > { %v608_v2 = vadd.f32 %v607_v1, %v412_v63  ;;  %v609_v4 = vpop.f32.mrb[7].mxu0  ;;  %670 = vmatpush1.bf16.msra.mxu1 %v620_v58  ;;  %v616_v6 = vmax.f32 %v604_v61, 0.0 }
 0x131   : > { %v610_v5 = vadd.f32 %v609_v4, %v412_v63  ;;  %v617_v8 = vmax.f32 %v606_v0, 0.0  ;;  %v846_v62 = vpop.permute.xlu0 %845  ;;  %v851_v63 = vpop.permute.xlu1 %850 }
 0x132   : > { %v618_v7 = vmax.f32 %v608_v2, 0.0 }
 0x133   : > { %v619_v9 = vmax.f32 %v610_v5, 0.0 }
 0x134   : > { %v622_v10 = vpack.c.bf16 %v618_v7, %v616_v6 }
 0x135   : > { %v623_v11 = vpack.c.bf16 %v619_v9, %v617_v8 }
 0x137   : > { %671 = vmatprep.subr.bf16.mxu1 %v623_v11 }
 0x138   : > { %672 = vmatpush1.bf16.msra.mxu1 %v622_v10 }
 0x13b   : > { %1016 = vmatmul.mubr.msk.bf16.vlgmr.msra.gmra.mrb[0].mxu1 %vm662_vm1, %v1082_v12 }
 0x13c   : > { %711 = vmatprep.mubr.bf16.mxu1 %v1094_v3 }
 0x143   : > { %1017 = vmatmul.mubr.msk.bf16.gmra.mrb[4].mxu1 %vm662_vm1, %v1083_v13 }
 0x144   : > { %810 = vmatprep.mubr.bf16.mxu1 %v1094_v3 }
 0x20e   : > { %v703_v15 = vpop.f32.mrb[0].mxu1 }
 0x20f   : > { %v704_v16 = vadd.f32 %v703_v15, %v635_v14  ;;  %v705_v17 = vpop.f32.mrb[1].mxu1 }
 0x210   : > { %v706_v19 = vadd.f32 %v705_v17, %v635_v14  ;;  %v707_v20 = vpop.f32.mrb[2].mxu1 }
 0x211   : > { %v708_v21 = vadd.f32 %v707_v20, %v640_v18  ;;  %v709_v22 = vpop.f32.mrb[3].mxu1  ;;  %v722_v24 = vmax.f32 %v704_v16, 0.0  ;;  %v856_v16 = vpop.permute.xlu0 %855 }
 0x212   : > { %v710_v23 = vadd.f32 %v709_v22, %v640_v18  ;;  %v723_v26 = vmax.f32 %v706_v19, 0.0 }
 0x213   : > { %v724_v25 = vmax.f32 %v708_v21, 0.0  ;;  %v861_v21 = vpop.permute.xlu1 %860 }
 0x214   : > { %v725_v27 = vmax.f32 %v710_v23, 0.0 }
 0x215   : > { %v730_v28 = vpack.c.bf16 %v724_v25, %v722_v24 }
 0x216   : > { %v731_v30 = vpack.c.bf16 %v725_v27, %v723_v26  ;;  %v713_v31 = vpop.f32.mrb[4].mxu1  ;;  %v891_v26 = vlaneseq }
 0x217   : > { %v714_v32 = vadd.f32 %v713_v31, %v645_v29  ;;  %v715_v33 = vpop.f32.mrb[5].mxu1 }
 0x218   : > { %v716_v35 = vadd.f32 %v715_v33, %v645_v29  ;;  %v717_v36 = vpop.f32.mrb[6].mxu1  ;;  %778 = vmatprep.subr.bf16.mxu1 %v731_v30  ;;  %vm923_vm2 = vcmp.lt.s32.totalorder %v891_v26, 256 }
 0x219   : > { %v718_v37 = vadd.f32 %v717_v36, %v650_v34  ;;  %v719_v38 = vpop.f32.mrb[7].mxu1  ;;  %779 = vmatpush1.bf16.msra.mxu1 %v730_v28  ;;  %v726_v40 = vmax.f32 %v714_v32, 0.0  ;;  %v892_v32 = vshrl.u32 %v891_v26, 7 }
 0x21a   : > { %v720_v39 = vadd.f32 %v719_v38, %v650_v34  ;;  %v727_v42 = vmax.f32 %v716_v35, 0.0  ;;  %v889_v38 = vld [vmem:[%s346_s25] sm:$0x3] }
 0x21b   : > { %v728_v41 = vmax.f32 %v718_v37, 0.0  ;;  %v893_v37 = vsub.s32 0, %v892_v32 }
 0x21c   : > { %v729_v43 = vmax.f32 %v720_v39, 0.0 }
 0x21d   : > { %v732_v44 = vpack.c.bf16 %v728_v41, %v726_v40  ;;  %v897_v40 = vsub.s32 1, %v892_v32  ;;  %v1095_v41 = vmov 1966171168  }
 0x21e   : > { %v733_v45 = vpack.c.bf16 %v729_v43, %v727_v42  ;;  %v907_v42 = vunpack.c.l.s4 %v1095_v41 }
 0x220   : > { %780 = vmatprep.subr.bf16.mxu1 %v733_v45 }
 0x221   : > { %781 = vmatpush1.bf16.msra.mxu1 %v732_v44 }
 0x224   : > { %1020 = vmatmul.mubr.msk.bf16.vlgmr.msra.gmra.mrb[8].mxu1 %vm662_vm1, %v1084_v46  ;;  %v894_v46 = vrot.slane %v889_v38, %v893_v37 }
 0x225   : > { %820 = vmatprep.mubr.bf16.mxu1 %v1094_v3 }
 0x22c   : > { %1021 = vmatmul.mubr.msk.bf16.gmra.mrb[12].mxu1 %vm662_vm1, %v1085_v47 }
 0x2f7   : > { %v812_v52 = vpop.f32.mrb[8].mxu1 }
 0x2f8   : > { %v813_v53 = vadd.f32 %v812_v52, %v745_v48  ;;  %v814_v54 = vpop.f32.mrb[9].mxu1 }
 0x2f9   : > { %v815_v55 = vadd.f32 %v814_v54, %v745_v48  ;;  %v816_v56 = vpop.f32.mrb[10].mxu1  ;;  %v898_v48 = vrot.slane %v889_v38, %v897_v40 }
 0x2fa   : > { %v831_v57 = vmax.f32 %v813_v53, 0.0  ;;  %v817_v58 = vadd.f32 %v816_v56, %v750_v49  ;;  %v818_v59 = vpop.f32.mrb[11].mxu1 }
 0x2fb   : > { %v832_v60 = vmax.f32 %v815_v55, 0.0  ;;  %v819_v3 = vadd.f32 %v818_v59, %v750_v49  ;;  %v908_v49 = vunpack.c.0.s8 %v907_v42 }
 0x2fc   : > { %v833_v61 = vmax.f32 %v817_v58, 0.0  ;;  %v863_v1 = vmul.f32 %v846_v62, %v831_v57 }
 0x2fd   : > { %v834_v0 = vmax.f32 %v819_v3, 0.0  ;;  %v864_v4 = vmul.f32 %v846_v62, %v832_v60  ;;  %v911_v54 = vsub.s32 %v908_v49, %v892_v32 }
 0x2fe   : > { %v865_v2 = vmul.f32 %v851_v63, %v833_v61 }
 0x2ff   : > { %v866_v5 = vmul.f32 %v851_v63, %v834_v0  ;;  %v822_v6 = vpop.f32.mrb[12].mxu1 }
 0x300   : > { %v871_v7 = vadd.f32 %v865_v2, %v863_v1  ;;  %v823_v8 = vadd.f32 %v822_v6, %v755_v50  ;;  %v824_v9 = vpop.f32.mrb[13].mxu1 }
 0x301   : > { %v880_v10 = vadd.f32 %v866_v5, %v864_v4  ;;  %v825_v11 = vadd.f32 %v824_v9, %v755_v50  ;;  %v826_v12 = vpop.f32.mrb[14].mxu1 }
 0x302   : > { %v835_v13 = vmax.f32 %v823_v8, 0.0  ;;  %v827_v14 = vadd.f32 %v826_v12, %v760_v51  ;;  %v828_v15 = vpop.f32.mrb[15].mxu1 }
 0x303   : > { %v836_v17 = vmax.f32 %v825_v11, 0.0  ;;  %v829_v18 = vadd.f32 %v828_v15, %v760_v51 }
 0x304   : > { %v867_v19 = vmul.f32 %v856_v16, %v835_v13  ;;  %v837_v20 = vmax.f32 %v827_v14, 0.0 }
 0x305   : > { %v868_v22 = vmul.f32 %v856_v16, %v836_v17  ;;  %v838_v23 = vmax.f32 %v829_v18, 0.0 }
 0x306   : > { %v872_v24 = vadd.f32 %v871_v7, %v867_v19  ;;  %v869_v25 = vmul.f32 %v861_v21, %v837_v20 }
 0x307   : > { %v881_v27 = vadd.f32 %v880_v10, %v868_v22  ;;  %v870_v28 = vmul.f32 %v861_v21, %v838_v23 }
 0x308   : > { %v873_v29 = vadd.f32 %v872_v24, %v869_v25 }
 0x309   : > { %v882_v30 = vadd.f32 %v881_v27, %v870_v28 }
 0x30a   : > { %v874_v31 = vrot.slane %v873_v29, 4 }
 0x30b   : > { %v883_v33 = vrot.slane %v882_v30, 4 }
 0x30c   : > { %v875_v34 = vadd.f32 %v874_v31, %v873_v29 }
 0x30d   : > { %v884_v35 = vadd.f32 %v883_v33, %v882_v30 }
 0x30e   : > { %v876_v36 = vrot.slane %v875_v34, 2 }
 0x30f   : > { %v885_v39 = vrot.slane %v884_v35, 2 }
 0x310   : > { %v877_v43 = vadd.f32 %v876_v36, %v875_v34 }
 0x311   : > { %v886_v44 = vadd.f32 %v885_v39, %v884_v35 }
 0x312   : > { %v878_v45 = vrot.slane %v877_v43, 1 }
 0x313   : > { %v887_v47 = vrot.slane %v886_v44, 1 }
 0x314   : > { %v879_v50 = vadd.f32 %v878_v45, %v877_v43 }
 0x315   : > { %v888_v51 = vadd.f32 %v887_v47, %v886_v44 }
 0x316   : > { %v901_v52 = vadd.f32 %v894_v46, %v879_v50 }
 0x317   : > { %v902_v53 = vadd.f32 %v898_v48, %v888_v51 }
 0x319   : > { %v905_v55 = vcombine.low %v901_v52, %v902_v53 }
 0x31b   : > { %v912_v56 = vrot.slane %v905_v55, %v911_v54 }
 0x31d   : > { %v919_v57 = vrot.slane %v912_v56, %v911_v54 }
 0x31f   : > { %925 = vst.msk [vmem:[%s351_s28] sm:$0x3] %vm923_vm2, %v919_v57 }
 0x320 PF: > { %s19_s30 = sadd.s32 1, %s1092_s30  }
 0x321   : > { %p16_p5 = scmp.ge.s32.totalorder %s19_s30, 4  }
 0x323   :  { %18 = sbr.rel (!%p16_p5) target bundleno = 1 (0x1), region = 89 }

</bundles_post_ra>
